<compile_context>
chip_gen: v5e
topology: v5e:2x2
jax: 0.10.0
libtpu: 0.0.40
codegen_flags: <defaults>
</compile_context>

<pallas_src>
import functools
import math

import jax
import jax.numpy as jnp
from jax.experimental import pallas as pl
from jax.experimental.pallas import tpu as pltpu


# ----------------------------------------------------------------------------
# helpers
# ----------------------------------------------------------------------------
def _round_up(x, m):
    return ((x + m - 1) // m) * m


def _pick_tile(Mp, max_tile=512):
    """Largest multiple-of-8 tile that divides Mp, <= max_tile, keeping >=2 grid steps."""
    limit = min(max_tile, Mp)
    if Mp >= 16:
        limit = min(limit, Mp // 2)
    best, t = 8, 8
    while t <= limit:
        if Mp % t == 0:
            best = t
        t += 8
    return best


def _pick_group(BH, max_g=64):
    """Group size (multiple of 8) for the attention grid, keeping >=2 grid steps."""
    if BH < 16:
        return BH
    limit = min(max_g, BH // 2)
    best, g = None, 8
    while g <= limit:
        if BH % g == 0:
            best = g
        g += 8
    return best if best is not None else BH


# ----------------------------------------------------------------------------
# Pallas kernels (all matmuls: bf16 inputs, f32 accumulation)
# ----------------------------------------------------------------------------
def _matmul_bias_kernel(x_ref, w_ref, b_ref, o_ref, *, relu):
    x = x_ref[...].astype(jnp.bfloat16)
    y = jnp.dot(x, w_ref[...], preferred_element_type=jnp.float32) + b_ref[...]
    if relu:
        y = jnp.maximum(y, 0.0)
    o_ref[...] = y.astype(o_ref.dtype)


def _ln(x, g, b):
    mean = jnp.mean(x, axis=-1, keepdims=True)
    c = x - mean
    var = jnp.mean(c * c, axis=-1, keepdims=True)
    return c * jax.lax.rsqrt(var + 1e-5) * g + b


def _add_ln_kernel(x_ref, r_ref, g_ref, b_ref, o_ref):
    o_ref[...] = _ln(x_ref[...] + r_ref[...], g_ref[...], b_ref[...])


def _lin_add_ln_kernel(a_ref, r_ref, w_ref, b_ref, g_ref, beta_ref, o_ref):
    # y = LN(residual + a @ W + b)
    a = a_ref[...].astype(jnp.bfloat16)
    y = jnp.dot(a, w_ref[...], preferred_element_type=jnp.float32) + b_ref[...]
    o_ref[...] = _ln(r_ref[...] + y, g_ref[...], beta_ref[...])


def _ffn_add_ln_kernel(x_ref, w1_ref, b1_ref, w2_ref, b2_ref, g_ref, beta_ref, o_ref):
    # y = LN(x + relu(x @ W1 + b1) @ W2 + b2)
    x = x_ref[...]
    h = jnp.dot(x.astype(jnp.bfloat16), w1_ref[...],
                preferred_element_type=jnp.float32) + b1_ref[...]
    h = jnp.maximum(h, 0.0)
    y = jnp.dot(h.astype(jnp.bfloat16), w2_ref[...],
                preferred_element_type=jnp.float32) + b2_ref[...]
    o_ref[...] = _ln(x + y, g_ref[...], beta_ref[...])


def _zcross_kernel(z_ref, wv_ref, bv_ref, wo_ref, bo_ref, o_ref):
    # Cross-attention with 32 identical memory rows collapses to out_proj(value_proj(z)).
    z = z_ref[...].astype(jnp.bfloat16)
    v = jnp.dot(z, wv_ref[...], preferred_element_type=jnp.float32) + bv_ref[...]
    o = jnp.dot(v.astype(jnp.bfloat16), wo_ref[...],
                preferred_element_type=jnp.float32) + bo_ref[...]
    o_ref[...] = o


def _softmax_attend(s, v_ref, o_ref):
    m = jnp.max(s, axis=-1, keepdims=True)
    e = jnp.exp(s - m)
    denom = jnp.sum(e, axis=-1, keepdims=True)
    p = e * pl.reciprocal(denom, approx=True)
    o = jnp.einsum("hqk,hkd->hqd", p.astype(jnp.bfloat16), v_ref[...],
                   preferred_element_type=jnp.float32)
    o_ref[...] = o.astype(o_ref.dtype)


def _mha_plain_kernel(q_ref, k_ref, v_ref, o_ref):
    s = jnp.einsum("hqd,hkd->hqk", q_ref[...], k_ref[...],
                   preferred_element_type=jnp.float32)
    _softmax_attend(s, v_ref, o_ref)


def _mha_causal_kernel(q_ref, k_ref, v_ref, o_ref):
    s = jnp.einsum("hqd,hkd->hqk", q_ref[...], k_ref[...],
                   preferred_element_type=jnp.float32)
    sq, sk = s.shape[1], s.shape[2]
    qi = jax.lax.broadcasted_iota(jnp.int32, (sq, sk), 0)
    ki = jax.lax.broadcasted_iota(jnp.int32, (sq, sk), 1)
    s = jnp.where((ki <= qi)[None, :, :], s, -1e9)
    _softmax_attend(s, v_ref, o_ref)


def _mha_keypad_kernel(len_ref, q_ref, k_ref, v_ref, o_ref):
    s = jnp.einsum("hqd,hkd->hqk", q_ref[...], k_ref[...],
                   preferred_element_type=jnp.float32)
    sk = s.shape[2]
    ki = jax.lax.broadcasted_iota(jnp.int32, (1, 1, sk), 2)
    valid = ki < len_ref[...][:, :, None]          # (G,1,Sk)
    s = jnp.where(valid, s, -1e9)
    _softmax_attend(s, v_ref, o_ref)


# ----------------------------------------------------------------------------
# pallas_call wrappers
# ----------------------------------------------------------------------------
def _rowwise_call(kernel, row_args, fixed_args, out_n, out_dtype, max_tile=512):
    """Tile over rows of row_args (each (M, C_i)); fixed_args (2-D) are replicated."""
    M = row_args[0].shape[0]
    Mp = _round_up(M, 8)
    tile_m = _pick_tile(Mp, max_tile)
    padded = [a if Mp == M else jnp.pad(a, ((0, Mp - M), (0, 0))) for a in row_args]
    in_specs = [pl.BlockSpec((tile_m, a.shape[1]), lambda i: (i, 0)) for a in padded]
    in_specs += [pl.BlockSpec(a.shape, lambda i: (0, 0)) for a in fixed_args]
    out = pl.pallas_call(
        kernel,
        out_shape=jax.ShapeDtypeStruct((Mp, out_n), out_dtype),
        grid=(Mp // tile_m,),
        in_specs=in_specs,
        out_specs=pl.BlockSpec((tile_m, out_n), lambda i: (i, 0)),
        compiler_params=pltpu.CompilerParams(dimension_semantics=("parallel",)),
    )(*padded, *fixed_args)
    return out if Mp == M else out[:M]


def pallas_linear(x, p, relu=False, out_dtype=jnp.float32):
    return _rowwise_call(functools.partial(_matmul_bias_kernel, relu=relu),
                         [x], [p["w"], p["b"]], p["w"].shape[1], out_dtype)


def pallas_lin_add_ln(attn2d, res2d, o_p, ln_p):
    return _rowwise_call(_lin_add_ln_kernel, [attn2d, res2d],
                         [o_p["w"], o_p["b"], ln_p["g"], ln_p["b"]],
                         res2d.shape[1], jnp.float32)


def pallas_add_ln(x2d, r2d, ln_p):
    return _rowwise_call(_add_ln_kernel, [x2d, r2d],
                         [ln_p["g"], ln_p["b"]], x2d.shape[1], jnp.float32)


def pallas_ffn_add_ln(x2d, ff1, ff2, ln_p):
    return _rowwise_call(_ffn_add_ln_kernel, [x2d],
                         [ff1["w"], ff1["b"], ff2["w"], ff2["b"], ln_p["g"], ln_p["b"]],
                         x2d.shape[1], jnp.float32)


def pallas_zcross(z, ca_p):
    return _rowwise_call(_zcross_kernel, [z],
                         [ca_p["v"]["w"], ca_p["v"]["b"], ca_p["o"]["w"], ca_p["o"]["b"]],
                         z.shape[1], jnp.float32)


def pallas_mha(q, k, v, mask_mode="none", lengths=None):
    """q: (BH, Sq, Dh) bf16 (already scaled), k/v: (BH, Sk, Dh) bf16."""
    BH, Sq, Dh = q.shape
    Sk = k.shape[1]
    G = _pick_group(BH)
    qkv_specs = [
        pl.BlockSpec((G, Sq, Dh), lambda i: (i, 0, 0)),
        pl.BlockSpec((G, Sk, Dh), lambda i: (i, 0, 0)),
        pl.BlockSpec((G, Sk, Dh), lambda i: (i, 0, 0)),
    ]
    if mask_mode == "keypad":
        lens = lengths.astype(jnp.int32).reshape(BH, 1)
        kernel = _mha_keypad_kernel
        in_specs = [pl.BlockSpec((G, 1), lambda i: (i, 0))] + qkv_specs
        args = (lens, q, k, v)
    elif mask_mode == "causal":
        kernel, in_specs, args = _mha_causal_kernel, qkv_specs, (q, k, v)
    else:
        kernel, in_specs, args = _mha_plain_kernel, qkv_specs, (q, k, v)
    return pl.pallas_call(
        kernel,
        out_shape=jax.ShapeDtypeStruct((BH, Sq, Dh), jnp.bfloat16),
        grid=(BH // G,),
        in_specs=in_specs,
        out_specs=pl.BlockSpec((G, Sq, Dh), lambda i: (i, 0, 0)),
        compiler_params=pltpu.CompilerParams(dimension_semantics=("parallel",)),
    )(*args)


# ----------------------------------------------------------------------------
# Transformer building blocks (glue around the Pallas kernels)
# ----------------------------------------------------------------------------
def _merge_heads(t, B_, S, H, Dh):
    return t.reshape(B_, H, S, Dh).transpose(0, 2, 1, 3).reshape(B_ * S, H * Dh)


def self_attention(x, sa_p, num_heads, mask_mode="none", lengths=None):
    """Fused QKV projection + softmax(QK^T + mask)V; returns (B_*S, D) bf16."""
    B_, S, D = x.shape
    Dh = D // num_heads
    qkv = pallas_linear(x.reshape(-1, D), sa_p["qkv"], out_dtype=jnp.bfloat16)
    qkv = qkv.reshape(B_, S, 3, num_heads, Dh)
    q = qkv[:, :, 0].transpose(0, 2, 1, 3).reshape(B_ * num_heads, S, Dh)
    k = qkv[:, :, 1].transpose(0, 2, 1, 3).reshape(B_ * num_heads, S, Dh)
    v = qkv[:, :, 2].transpose(0, 2, 1, 3).reshape(B_ * num_heads, S, Dh)
    lens_bh = None
    if mask_mode == "keypad":
        lens_bh = jnp.repeat(lengths.reshape(-1).astype(jnp.int32), num_heads)
    attn = pallas_mha(q, k, v, mask_mode=mask_mode, lengths=lens_bh)
    return _merge_heads(attn, B_, S, num_heads, Dh)


def encoder_layer(x, p, nhead, mask_mode="none", lengths=None):
    # post-norm (torch default norm_first=False), relu activation
    B_, S, D = x.shape
    attn = self_attention(x, p["sa"], nhead, mask_mode, lengths)
    x2 = pallas_lin_add_ln(attn, x.reshape(-1, D), p["sa"]["o"], p["ln1"])
    x3 = pallas_ffn_add_ln(x2, p["ff1"], p["ff2"], p["ln2"])
    return x3.reshape(B_, S, D)


def decoder_time_layer(x, zcross, p, nhead=8):
    # cross-attention over 32 identical memory rows == broadcast of zcross (exact).
    B, S, D = x.shape
    attn = self_attention(x, p["sa"], nhead)
    x2 = pallas_lin_add_ln(attn, x.reshape(-1, D), p["sa"]["o"], p["ln1"])
    r = jnp.broadcast_to(zcross[:, None, :], (B, S, D)).reshape(-1, D)
    x3 = pallas_add_ln(x2, r, p["ln2"])
    x4 = pallas_ffn_add_ln(x3, p["ff1"], p["ff2"], p["ln3"])
    return x4.reshape(B, S, D)


def decoder_note_layer(x, mem_k, mem_v, p, nhead=4):
    B_, S, D = x.shape
    Dh = D // nhead
    attn = self_attention(x, p["sa"], nhead)                      # no tgt mask
    x2 = pallas_lin_add_ln(attn, x.reshape(-1, D), p["sa"]["o"], p["ln1"])
    q = pallas_linear(x2, p["ca"]["q"], out_dtype=jnp.bfloat16)   # scale folded into Wq
    q = q.reshape(B_, S, nhead, Dh).transpose(0, 2, 1, 3).reshape(B_ * nhead, S, Dh)
    attn = pallas_mha(q, mem_k, mem_v, mask_mode="causal")        # causal memory mask
    attn = _merge_heads(attn, B_, S, nhead, Dh)
    x3 = pallas_lin_add_ln(attn, x2, p["ca"]["o"], p["ln2"])
    x4 = pallas_ffn_add_ln(x3, p["ff1"], p["ff2"], p["ln3"])
    return x4.reshape(B_, S, D)


def precompute_note_memory_kv(mem, kv_all_p, num_layers, nhead, dh):
    """K/V projections of the (layer-invariant) memory for all layers in one matmul."""
    B_, S_mem, D = mem.shape
    kv = pallas_linear(mem.reshape(-1, D), kv_all_p, out_dtype=jnp.bfloat16)
    kv = kv.reshape(B_, S_mem, num_layers, 2, nhead, dh)
    mem_ks, mem_vs = [], []
    for l in range(num_layers):
        mem_ks.append(kv[:, :, l, 0].transpose(0, 2, 1, 3).reshape(B_ * nhead, S_mem, dh))
        mem_vs.append(kv[:, :, l, 1].transpose(0, 2, 1, 3).reshape(B_ * nhead, S_mem, dh))
    return mem_ks, mem_vs


# ----------------------------------------------------------------------------
# Model constants (from VAETR.__init__ defaults)
# ----------------------------------------------------------------------------
MAX_SIMU_NOTE = 16
NUM_STEP = 32
PITCH_RANGE = 127 - 0 + 3          # 130
PITCH_PAD = 130
DUR_WIDTH = 5
NOTE_SIZE = PITCH_RANGE + DUR_WIDTH        # 135
NOTE_EMB = 128
NOTE_HID = 32
ENC_TIME_HID = 512
Z_SIZE = 512
N_ENC_NOTE_LAYERS = 8
N_ENC_TIME_LAYERS = 4
N_DEC_TIME_LAYERS = 4
N_DEC_NOTE_LAYERS = 8


def positional_encoding(emb_dim=ENC_TIME_HID, max_position=NUM_STEP):
    pos = jnp.arange(max_position, dtype=jnp.float32)[:, None]
    _2i = jnp.arange(0, emb_dim, 2, dtype=jnp.float32)
    angle = pos / jnp.power(10000.0, _2i / emb_dim)
    pe = jnp.zeros((max_position, emb_dim), jnp.float32)
    pe = pe.at[:, 0::2].set(jnp.sin(angle))
    pe = pe.at[:, 1::2].set(jnp.cos(angle))
    return pe


def make_params(key):
    keys = iter(jax.random.split(key, 4096))

    def rand_lin(i, o, scale=0.05):
        return (jax.random.normal(next(keys), (i, o), jnp.float32) * scale,
                jax.random.normal(next(keys), (o,), jnp.float32) * 0.01)

    def as_rt(w, b):  # runtime form: bf16 weight, (1, N) f32 bias
        return {"w": w.astype(jnp.bfloat16), "b": b.reshape(1, -1).astype(jnp.float32)}

    def lin(i, o, scale=0.05):
        return as_rt(*rand_lin(i, o, scale))

    def ln(d):
        return {"g": jnp.ones((1, d), jnp.float32), "b": jnp.zeros((1, d), jnp.float32)}

    def attn(d, nhead):
        sc = 1.0 / math.sqrt(d // nhead)
        wq, bq = rand_lin(d, d)
        wk, bk = rand_lin(d, d)
        wv, bv = rand_lin(d, d)
        wo, bo = rand_lin(d, d)
        return {"qkv": as_rt(jnp.concatenate([wq * sc, wk, wv], axis=1),
                             jnp.concatenate([bq * sc, bk, bv])),
                "o": as_rt(wo, bo)}

    def enc_layer(d, dff, nhead):
        return {"sa": attn(d, nhead), "ln1": ln(d), "ln2": ln(d),
                "ff1": lin(d, dff), "ff2": lin(dff, d)}

    params = {
        "note_emb": lin(NOTE_SIZE, NOTE_EMB),
        "proj": lin(NOTE_EMB, NOTE_HID),
        "enc_notes": [enc_layer(NOTE_EMB, NOTE_HID + NOTE_EMB, 4)
                      for _ in range(N_ENC_NOTE_LAYERS)],
        "enc_time": [enc_layer(ENC_TIME_HID, ENC_TIME_HID, 8)
                     for _ in range(N_ENC_TIME_LAYERS)],
        "enc_time_out": lin(ENC_TIME_HID, 32),
        "dec_time_token": jax.random.normal(next(keys), (32, 512), jnp.float32) * 0.05,
        "dec_note_token": jax.random.normal(next(keys), (16, 32), jnp.float32) * 0.05,
        "pos_enc": positional_encoding(),
        # enc_note_token exists in the torch module but is unused in forward().
    }

    # fused mu/std head: one (1024, 1024) matmul
    wmu, bmu = rand_lin(2 * ENC_TIME_HID, Z_SIZE)
    wstd, bstd = rand_lin(2 * ENC_TIME_HID, Z_SIZE)
    params["mu_std"] = as_rt(jnp.concatenate([wmu, wstd], axis=1),
                             jnp.concatenate([bmu, bstd]))

    # decoder-time layers: cross-attn only needs (Wv, bv, Wo, bo) thanks to the
    # identical-memory shortcut.
    dec_time = []
    for _ in range(N_DEC_TIME_LAYERS):
        wv, bv = rand_lin(512, 512)
        wo, bo = rand_lin(512, 512)
        dec_time.append({"sa": attn(512, 8),
                         "ca": {"v": as_rt(wv, bv), "o": as_rt(wo, bo)},
                         "ln1": ln(512), "ln2": ln(512), "ln3": ln(512),
                         "ff1": lin(512, 512), "ff2": lin(512, 512)})
    params["dec_time"] = dec_time

    # decoder-note layers: per-layer Q/O for cross-attn (scale folded into Q);
    # K/V weights of all layers packed into one (32, 8*64) matrix.
    dec_notes, kv_ws, kv_bs = [], [], []
    sc = 1.0 / math.sqrt(32 // 4)
    for _ in range(N_DEC_NOTE_LAYERS):
        wk, bk = rand_lin(32, 32)
        wv, bv = rand_lin(32, 32)
        wq, bq = rand_lin(32, 32)
        wo, bo = rand_lin(32, 32)
        kv_ws.append(jnp.concatenate([wk, wv], axis=1))
        kv_bs.append(jnp.concatenate([bk, bv]))
        dec_notes.append({"sa": attn(32, 4),
                          "ca": {"q": as_rt(wq * sc, bq * sc), "o": as_rt(wo, bo)},
                          "ln1": ln(32), "ln2": ln(32), "ln3": ln(32),
                          "ff1": lin(32, 32), "ff2": lin(32, 32)})
    params["dec_notes"] = dec_notes
    params["dec_note_ca_kv"] = as_rt(jnp.concatenate(kv_ws, axis=1),
                                     jnp.concatenate(kv_bs))

    # fused pitch+dur output head: (32, 130+10)
    wp, bp = rand_lin(32, PITCH_RANGE)
    wd, bd = rand_lin(32, DUR_WIDTH * 2)
    params["head"] = as_rt(jnp.concatenate([wp, wd], axis=1),
                           jnp.concatenate([bp, bd]))
    return params


# ----------------------------------------------------------------------------
# VAETR forward
# ----------------------------------------------------------------------------
def vaetr_forward(params, x_idx, sample_key, sample=True):
    B = x_idx.shape[0]

    # --- get_len_index_tensor / index_tensor_to_multihot_tensor -------------
    pitch_idx = x_idx[..., 0]                                  # (B, 32, 16)
    dur_part = x_idx[..., 1:].astype(jnp.float32)              # (B, 32, 16, 5)
    lengths = MAX_SIMU_NOTE - jnp.sum(pitch_idx == PITCH_PAD, axis=-1)   # (B, 32)
    onehot = jax.nn.one_hot(pitch_idx, PITCH_RANGE + 1, dtype=jnp.float32)
    multihot = jnp.concatenate([onehot[..., :PITCH_RANGE], dur_part], axis=-1)

    # --- encoder -------------------------------------------------------------
    emb = pallas_linear(multihot.reshape(-1, NOTE_SIZE), params["note_emb"])
    x = emb.reshape(B * NUM_STEP, MAX_SIMU_NOTE, NOTE_EMB)
    lens_flat = lengths.reshape(-1).astype(jnp.int32)          # (B*32,)

    for layer in params["enc_notes"]:
        x = encoder_layer(x, layer, nhead=4, mask_mode="keypad", lengths=lens_flat)

    x = pallas_linear(x.reshape(-1, NOTE_EMB), params["proj"])
    x = x.reshape(B, NUM_STEP, ENC_TIME_HID) + params["pos_enc"][None]

    for layer in params["enc_time"]:
        x = encoder_layer(x, layer, nhead=8)

    x = pallas_linear(x.reshape(-1, ENC_TIME_HID), params["enc_time_out"])  # (B*32, 32)
    x = x.reshape(B, 2 * ENC_TIME_HID)                                      # (B, 1024)

    mu_std = pallas_linear(x, params["mu_std"])                             # (B, 1024)
    mu = mu_std[:, :Z_SIZE]
    std = jnp.exp(mu_std[:, Z_SIZE:])

    if sample:
        eps = jax.random.normal(sample_key, mu.shape, jnp.float32)
        z = mu + std * eps
    else:
        z = mu

    # --- decoder -------------------------------------------------------------
    t = jnp.broadcast_to(params["dec_time_token"][None], (B, 32, 512))
    for layer in params["dec_time"]:
        zc = pallas_zcross(z, layer["ca"])                     # (B, 512)
        t = decoder_time_layer(t, zc, layer, nhead=8)

    mem = t.reshape(B * NUM_STEP, 16, 32)
    mem_ks, mem_vs = precompute_note_memory_kv(
        mem, params["dec_note_ca_kv"], N_DEC_NOTE_LAYERS, nhead=4, dh=8)

    n = jnp.broadcast_to(params["dec_note_token"][None], (B * NUM_STEP, 16, 32))
    for l, layer in enumerate(params["dec_notes"]):
        n = decoder_note_layer(n, mem_ks[l], mem_vs[l], layer, nhead=4)

    n = n.reshape(B, NUM_STEP, 16, 32)[:, :, 1:, :]            # (B, 32, 15, 32)
    flat = n.reshape(-1, 32)
    head = pallas_linear(flat, params["head"])                 # (B*32*15, 140)
    pitch_outs = head[:, :PITCH_RANGE].reshape(B, NUM_STEP, 15, PITCH_RANGE)
    dur_outs = head[:, PITCH_RANGE:].reshape(B, NUM_STEP, 15, DUR_WIDTH, 2)

    return pitch_outs, dur_outs, (mu, std)


# ----------------------------------------------------------------------------
# main
# ----------------------------------------------------------------------------
def make_input(key, B=2):
    k1, k2, k3 = jax.random.split(key, 3)
    pitch = jax.random.randint(k1, (B, NUM_STEP, MAX_SIMU_NOTE), 0, 128)
    n_valid = jax.random.randint(k2, (B, NUM_STEP), 1, MAX_SIMU_NOTE + 1)   # >=1 valid note
    note_pos = jnp.arange(MAX_SIMU_NOTE)
    pitch = jnp.where(note_pos[None, None, :] < n_valid[..., None], pitch, PITCH_PAD)
    dur = jax.random.randint(k3, (B, NUM_STEP, MAX_SIMU_NOTE, DUR_WIDTH), 0, 2)
    return jnp.concatenate([pitch[..., None], dur], axis=-1).astype(jnp.int32)


if __name__ == "__main__":
    key = jax.random.PRNGKey(0)
    pkey, dkey, skey = jax.random.split(key, 3)

    params = make_params(pkey)
    x_idx = make_input(dkey, B=2)

    pitch_outs, dur_outs, (mu, std) = vaetr_forward(params, x_idx, skey, sample=True)
    jax.block_until_ready((pitch_outs, dur_outs, mu, std))

    assert pitch_outs.shape == (2, 32, 15, 130), pitch_outs.shape
    assert dur_outs.shape == (2, 32, 15, 5, 2), dur_outs.shape
    assert mu.shape == (2, 512) and std.shape == (2, 512)
    assert bool(jnp.all(jnp.isfinite(pitch_outs)))
    assert bool(jnp.all(jnp.isfinite(dur_outs)))
    assert bool(jnp.all(jnp.isfinite(mu))) and bool(jnp.all(jnp.isfinite(std)))

    print("KERNEL_OK")
</pallas_src>

<mosaic_0001>
module attributes {stable_mosaic.version = 11 : i64} {
  func.func @_matmul_bias_kernel(%arg0: i32, %arg1: memref<512x135xf32, #tpu.memory_space<vmem>>, %arg2: memref<135x128xbf16, #tpu.memory_space<vmem>>, %arg3: memref<1x128xf32, #tpu.memory_space<vmem>>, %arg4: memref<512x128xf32, #tpu.memory_space<vmem>>) attributes {dimension_semantics = [#tpu.dimension_semantics<parallel>], iteration_bounds = array<i64: 2>, scalar_prefetch = 0 : i64, scratch_operands = 0 : i64, tpu.core_type = #tpu.core_type<tc>, window_params = [{transform_indices = @transform_0, window_bounds = array<i64: 512, 135>}, {pipeline_mode = #tpu.pipeline_mode<synchronous>, transform_indices = @transform_1, window_bounds = array<i64: 135, 128>}, {pipeline_mode = #tpu.pipeline_mode<synchronous>, transform_indices = @transform_2, window_bounds = array<i64: 1, 128>}, {transform_indices = @transform_3, window_bounds = array<i64: 512, 128>}]} {
    %c0 = arith.constant 0 : index
    %c0_0 = arith.constant 0 : index
    %0 = vector.load %arg1[%c0, %c0_0] : memref<512x135xf32, #tpu.memory_space<vmem>>, vector<512x135xf32>
    %1 = arith.truncf %0 : vector<512x135xf32> to vector<512x135xbf16>
    %c0_1 = arith.constant 0 : index
    %c0_2 = arith.constant 0 : index
    %2 = vector.load %arg2[%c0_1, %c0_2] : memref<135x128xbf16, #tpu.memory_space<vmem>>, vector<135x128xbf16>
    %cst = arith.constant dense<0.000000e+00> : vector<512x128xf32>
    %3 = tpu.matmul %1, %2, %cst {dimension_numbers = #tpu.dot_dimension_numbers<[1], [0], [0], [1], [0, 0, 1, 1], [], []>} : vector<512x135xbf16>, vector<135x128xbf16>, vector<512x128xf32> -> vector<512x128xf32>
    %c0_3 = arith.constant 0 : index
    %c0_4 = arith.constant 0 : index
    %4 = vector.load %arg3[%c0_3, %c0_4] : memref<1x128xf32, #tpu.memory_space<vmem>>, vector<1x128xf32>
    %5 = vector.broadcast %4 : vector<1x128xf32> to vector<512x128xf32>
    %6 = arith.addf %3, %5 : vector<512x128xf32>
    %c0_5 = arith.constant 0 : index
    %c0_6 = arith.constant 0 : index
    %7 = vector.load %arg4[%c0_5, %c0_6] : memref<512x128xf32, #tpu.memory_space<vmem>>, vector<512x128xf32>
    tpu.vector_store %arg4[%c0_5, %c0_6], %6 {strides = array<i32>} : memref<512x128xf32, #tpu.memory_space<vmem>>, vector<512x128xf32>,
    return
  }
  func.func @transform_0(%arg0: i32) -> (i32, i32) {
    %c0_i32 = arith.constant 0 : i32
    %c0_i32_0 = arith.constant 0 : i32
    return %arg0, %c0_i32 : i32, i32
  }
  func.func @transform_1(%arg0: i32) -> (i32, i32) {
    %c0_i32 = arith.constant 0 : i32
    %c0_i32_0 = arith.constant 0 : i32
    %c0_i32_1 = arith.constant 0 : i32
    return %c0_i32, %c0_i32_0 : i32, i32
  }
  func.func @transform_2(%arg0: i32) -> (i32, i32) {
    %c0_i32 = arith.constant 0 : i32
    %c0_i32_0 = arith.constant 0 : i32
    %c0_i32_1 = arith.constant 0 : i32
    return %c0_i32, %c0_i32_0 : i32, i32
  }
  func.func @transform_3(%arg0: i32) -> (i32, i32) {
    %c0_i32 = arith.constant 0 : i32
    %c0_i32_0 = arith.constant 0 : i32
    return %arg0, %c0_i32 : i32, i32
  }
}

</mosaic_0001>

<bundles_post_ra>
// kernel: tpu_custom_call.1
= control target key start
LH: loop header
LB: loop body
LE: loop exit
PB: predicated region body
PF: predicated region fallthrough
CT: control target
= control target key end

     0   :  { %8 = vsyncpa [#allocation3], 0  ;;  %s1708_s0 = inlined_call_operand.vmem [shape: f32[1024,135], index: 0, kind: input, shape index: {}]   ;;  %s1709_s1 = inlined_call_operand.vmem [shape: bf16[135,128], index: 1, kind: input, shape index: {}]   ;;  %s1710_s2 = inlined_call_operand.vmem [shape: f32[1,128], index: 2, kind: input, shape index: {}]   ;;  %s1711_s3 = inlined_call_operand.hbm [shape: f32[1024,128], index: 3, kind: output, shape index: {}]  }
   0x1   :  { %10 = vsyncpa [#allocation3 + $0x1], 0  ;;  %s1250_s12 = smov 0   ;;  %s1252_s13 = smov 0  }
   0x2   :  { %s1254_s14 = smov 0   ;;  %s1256_s15 = smov 0  }
   0x3 LB: > { %s1271_s16 = sadd.s32 4294967295, %s1225_s15   ;;  %s1024_s17 = sadd.s32 4294967294, %s1225_s15   ;;  %s1225_s15 = sphi %s1256_s15, %s1717_s15   ;;  %s1221_s14 = sphi %s1254_s14, %s1716_s14   ;;  %s1217_s13 = sphi %s1252_s13, %s1715_s13   ;;  %s1213_s12 = sphi %s1250_s12, %s1714_s12  }
   0x4   : > { %s1275_s18 = sadd.s32 1, %s1225_s15   ;;  %s91_s19 = sadd.s32 1, %s1221_s14 }
   0x5   : > { %s88_s20 = ssub.s32 %s1225_s15, %s1275_s18  ;;  %p101_p0 = scmp.ne.s32.totalorder %s1221_s14, %s1217_s13 }
   0x6   : > { %p89_p1 = scmp.eq.s32.totalorder %s88_s20, 0  ;;  %p102_p2 = scmp.eq.s32.totalorder %s1271_s16, 1 }
   0x7   : > { %p107_p3 = scmp.ne.s32.totalorder %s1217_s13, %s1213_s12  ;;  %p108_p4 = scmp.eq.s32.totalorder %s1024_s17, 1 }
   0x8   : > { %s1286_s21 = scalar_select %p89_p1, %s1221_s14, %s91_s19  }
   0x9   : > { %p1288_p5 = por %p102_p2, %p101_p0  ;;  %p1292_p6 = por %p108_p4, %p107_p3 }
   0xa   : > { %p1027_p7 = scmp.ge.s32.totalorder %s1225_s15, 1  ;;  %p142_p8 = scmp.lt.s32.totalorder %s1225_s15, 3 }
   0xc   : > { %p143_p9 = pnand %p1027_p7, %p142_p8 }
   0xd   : > { %s1029_s28 = sshll.u32 (!%p143_p9), %s1271_s16, 6  ;;  %s164_s29 = sand.u32 (!%p143_p9), 1, %s1217_s13  }
   0xe   : > { %146 = sbr.rel (%p143_p9) target bundleno = 439 (0x1b7), region = 32  ;;  %p168_p10 = scmp.lt.s32.totalorder (!%p143_p9), %s1029_s28, 127 }
   0xf   : > { %s1028_s5 = sshll.u32 (!%p143_p9), %s164_s29, 9  ;;  %s1110_s7 = sshll.u32 (!%p143_p9), %s1271_s16, 9 }
  0x10   : > { %s1442_s6 = scalar_lea.vmem (!%p143_p9), [#allocation2], %s1028_s5  ;;  %s958_s10 = scalar_lea.hbm (!%p143_p9), %s1711_s3, %s1110_s7 }
  0x11   : > { %s959_s11 = sshll.u32 (!%p143_p9), %s1442_s6, 4  ;;  %s961_s17 = sshll.u32 (!%p143_p9), %s958_s10, 4  ;;  %s960_s11 = int_to_ptr.vmem [resolvable:$true] %s959_s11  ;;  %s962_s17 = int_to_ptr.hbm [resolvable:$true] %s961_s17 }
  0x12   : > { %s947_s16 = scalar_lea.sflag (!%p143_p9), [#allocation3], %s164_s29  ;;  %s1177_s19 = sshra.s32 (!%p143_p9), %s962_s17, 4  ;;  %s1178_s19 = int_to_ptr.hbm [resolvable:$true] %s1177_s19 }
  0x13   : > { %v1109_v0 = vld [vmem:[%s1709_s1 + $0x38] sm:$0xff]  ;;  %v384_v1 = vld [vmem:[%s1709_s1 + $0x40] sm:$0xf]  ;;  %vm537_vm0 = vcmask 1042432   ;;  %vm538_vm1 = vcmask 1043456   ;;  %v1108_v3 = vld [vmem:[%s1709_s1 + $0x30] sm:$0xff]  ;;  %p1184_p0 = scmp.lt.s32.totalorder %s1178_s19, %s1711_s3 }
  0x14   : > { %v422_v2 = vunpack.c.l.b16 %v384_v1  ;;  %544 = vmatpush.bf16.msra.mxu0 %v1109_v0  ;;  %1111 = vmatpush.bf16.msra.mxu2 %v1109_v0  ;;  %v1227_v4 = vmov 65535   ;;  %s1719_s28 = smov (!%p168_p10, %s1029_s28), 127  ;;  %v1107_v9 = vld [vmem:[%s1709_s1 + $0x28] sm:$0xff]  ;;  %vm440_vm2 = vcmask 56320   ;;  %v1106_v13 = vld [vmem:[%s1709_s1 + $0x20] sm:$0xff]  ;;  %v1105_v17 = vld [vmem:[%s1709_s1 + $0x18] sm:$0xff] }
  0x15   : > { %v539_v5 = vsel %vm537_vm0, 4294967295, %v1227_v4  ;;  %s1101_s4 = sshll.u32 %s1719_s28, 4  ;;  %v1104_v18 = vld [vmem:[%s1709_s1 + $0x10] sm:$0xff]  ;;  %v1103_v21 = vld [vmem:[%s1709_s1 + $0x8] sm:$0xff]  ;;  %v1102_v23 = vld [vmem:[%s1709_s1] sm:$0xff]  ;;  %s1179_s20 = scalar_lea.hbm %s1178_s19, 512 }
  0x16   : > { %v431_v6 = vpack.c.b16 %v422_v2, %v422_v2  ;;  %v540_v7 = vsel %vm538_vm1, %v539_v5, 0  ;;  %s1314_s9 = scalar_lea.vmem %s1708_s0, %s1101_s4  ;;  %p1180_p11 = scmp.ne.s32.totalorder %s1178_s19, %s1179_s20 }
  0x17   : > { %v177_v10 = vld [vmem:[%s1314_s9 + $0x8] sm:$0xff]  ;;  %v179_v11 = vld [vmem:[%s1314_s9 + $0x18] sm:$0xff]  ;;  %v176_v24 = vld [vmem:[%s1314_s9] sm:$0xff]  ;;  %s1183_s26 = scalar_lea.hbm %s1711_s3, 1024 }
  0x18   : > { %v542_v8 = vand.u32 %v540_v7, %v431_v6  ;;  %545 = vmatpush.bf16.msra.mxu0 %v1108_v3  ;;  %1112 = vmatpush.bf16.msra.mxu2 %v1108_v3  ;;  %v305_v12 = vpack.c.bf16 %v179_v11, %v177_v10  ;;  %v245_v14 = vld [vmem:[%s1314_s9 + $0x228] sm:$0xff]  ;;  %v247_v15 = vld [vmem:[%s1314_s9 + $0x238] sm:$0xff]  ;;  %v178_v27 = vld [vmem:[%s1314_s9 + $0x10] sm:$0xff]  ;;  %p1181_p12 = pnand %p1180_p11, %p1288_p5  ;;  %p1185_p1 = scmp.lt.s32.totalorder %s1183_s26, %s1179_s20 }
  0x19   : > { %v339_v16 = vpack.c.bf16 %v247_v15, %v245_v14  ;;  %v181_v19 = vld [vmem:[%s1314_s9 + $0x28] sm:$0xff]  ;;  %v183_v20 = vld [vmem:[%s1314_s9 + $0x38] sm:$0xff]  ;;  %v240_v28 = vld [vmem:[%s1314_s9 + $0x200] sm:$0xff]  ;;  %v304_v31 = vpack.c.bf16 %v178_v27, %v176_v24 }
  0x1a   : > { %720 = vmatpush.bf16.msra.mxu1 %v542_v8  ;;  %1119 = vmatpush.bf16.msra.mxu3 %v542_v8  ;;  %v307_v22 = vpack.c.bf16 %v183_v20, %v181_v19  ;;  %v249_v25 = vld [vmem:[%s1314_s9 + $0x248] sm:$0xff]  ;;  %v251_v26 = vld [vmem:[%s1314_s9 + $0x258] sm:$0xff]  ;;  %v242_v29 = vld [vmem:[%s1314_s9 + $0x210] sm:$0xff]  ;;  %p1182_p13 = pneg %p1181_p12  ;;  %p1186_p2 = por %p1185_p1, %p1184_p0 }
  0x1b   : > { %v341_v30 = vpack.c.bf16 %v251_v26, %v249_v25  ;;  %v336_v32 = vpack.c.bf16 %v242_v29, %v240_v28  ;;  %v185_v33 = vld [vmem:[%s1314_s9 + $0x48] sm:$0xff]  ;;  %v187_v34 = vld [vmem:[%s1314_s9 + $0x58] sm:$0xff]  ;;  %v180_v36 = vld [vmem:[%s1314_s9 + $0x20] sm:$0xff] }
  0x1c   : > { %546 = vmatpush.bf16.msra.mxu0 %v1107_v9  ;;  %1113 = vmatpush.bf16.msra.mxu2 %v1107_v9  ;;  %v309_v35 = vpack.c.bf16 %v187_v34, %v185_v33  ;;  %v253_v37 = vld [vmem:[%s1314_s9 + $0x268] sm:$0xff]  ;;  %v255_v38 = vld [vmem:[%s1314_s9 + $0x278] sm:$0xff]  ;;  %v182_v39 = vld [vmem:[%s1314_s9 + $0x30] sm:$0xff]  ;;  %p1187_p3 = pnand %p1186_p2, %p1182_p13 }
  0x1d   : > { %1064 = vmatmul.msk.bf16.vlgmr.msra.gmra.mxu1 %vm440_vm2, %v305_v12  ;;  %1081 = vmatmul.msk.bf16.vlgmr.msra.gmra.mxu3 %vm440_vm2, %v339_v16  ;;  %v244_v40 = vld [vmem:[%s1314_s9 + $0x220] sm:$0xff]  ;;  %v246_v41 = vld [vmem:[%s1314_s9 + $0x230] sm:$0xff]  ;;  %v343_v42 = vpack.c.bf16 %v255_v38, %v253_v37  ;;  %v306_v43 = vpack.c.bf16 %v182_v39, %v180_v36  ;;  %v189_v45 = vld [vmem:[%s1314_s9 + $0x68] sm:$0xff] }
  0x1e   : > { %v338_v44 = vpack.c.bf16 %v246_v41, %v244_v40  ;;  %v191_v46 = vld [vmem:[%s1314_s9 + $0x78] sm:$0xff]  ;;  %v184_v48 = vld [vmem:[%s1314_s9 + $0x40] sm:$0xff]  ;;  %v257_v49 = vld [vmem:[%s1314_s9 + $0x288] sm:$0xff] }
  0x1f   : > { %v311_v47 = vpack.c.bf16 %v191_v46, %v189_v45  ;;  %v259_v50 = vld [vmem:[%s1314_s9 + $0x298] sm:$0xff]  ;;  %v186_v51 = vld [vmem:[%s1314_s9 + $0x50] sm:$0xff]  ;;  %v248_v52 = vld [vmem:[%s1314_s9 + $0x240] sm:$0xff] }
  0x20   : > { %547 = vmatpush.bf16.msra.mxu0 %v1106_v13  ;;  %1114 = vmatpush.bf16.msra.mxu2 %v1106_v13  ;;  %v250_v53 = vld [vmem:[%s1314_s9 + $0x250] sm:$0xff]  ;;  %v345_v54 = vpack.c.bf16 %v259_v50, %v257_v49  ;;  %v308_v55 = vpack.c.bf16 %v186_v51, %v184_v48  ;;  %v193_v57 = vld [vmem:[%s1314_s9 + $0x88] sm:$0xff]  ;;  %v195_v58 = vld [vmem:[%s1314_s9 + $0x98] sm:$0xff] }
  0x21   : > { %v340_v56 = vpack.c.bf16 %v250_v53, %v248_v52  ;;  %v313_v59 = vpack.c.bf16 %v195_v58, %v193_v57  ;;  %v188_v60 = vld [vmem:[%s1314_s9 + $0x60] sm:$0xff]  ;;  %v261_v61 = vld [vmem:[%s1314_s9 + $0x2a8] sm:$0xff]  ;;  %v263_v62 = vld [vmem:[%s1314_s9 + $0x2b8] sm:$0xff] }
  0x22   : > { %v190_v63 = vld [vmem:[%s1314_s9 + $0x70] sm:$0xff]  ;;  %v252_v0 = vld [vmem:[%s1314_s9 + $0x260] sm:$0xff]  ;;  %v347_v2 = vpack.c.bf16 %v263_v62, %v261_v61  ;;  %v197_v5 = vld [vmem:[%s1314_s9 + $0xa8] sm:$0xff] }
  0x23   : > { %v254_v1 = vld [vmem:[%s1314_s9 + $0x270] sm:$0xff]  ;;  %v310_v3 = vpack.c.bf16 %v190_v63, %v188_v60  ;;  %v199_v6 = vld [vmem:[%s1314_s9 + $0xb8] sm:$0xff]  ;;  %v192_v8 = vld [vmem:[%s1314_s9 + $0x80] sm:$0xff] }
  0x24   : > { %548 = vmatpush.bf16.msra.mxu0 %v1105_v17  ;;  %1115 = vmatpush.bf16.msra.mxu2 %v1105_v17  ;;  %v342_v4 = vpack.c.bf16 %v254_v1, %v252_v0  ;;  %v315_v7 = vpack.c.bf16 %v199_v6, %v197_v5  ;;  %v265_v9 = vld [vmem:[%s1314_s9 + $0x2c8] sm:$0xff]  ;;  %v267_v10 = vld [vmem:[%s1314_s9 + $0x2d8] sm:$0xff]  ;;  %v194_v11 = vld [vmem:[%s1314_s9 + $0x90] sm:$0xff] }
  0x25   : > { %v256_v12 = vld [vmem:[%s1314_s9 + $0x280] sm:$0xff]  ;;  %v258_v13 = vld [vmem:[%s1314_s9 + $0x290] sm:$0xff]  ;;  %v349_v14 = vpack.c.bf16 %v267_v10, %v265_v9  ;;  %v312_v15 = vpack.c.bf16 %v194_v11, %v192_v8  ;;  %v201_v17 = vld [vmem:[%s1314_s9 + $0xc8] sm:$0xff] }
  0x26   : > { %v344_v16 = vpack.c.bf16 %v258_v13, %v256_v12  ;;  %v196_v20 = vld [vmem:[%s1314_s9 + $0xa0] sm:$0xff]  ;;  %v262_v25 = vld [vmem:[%s1314_s9 + $0x2b0] sm:$0xff]  ;;  %v205_v29 = vld [vmem:[%s1314_s9 + $0xe8] sm:$0xff] }
  0x27   : > { %v260_v24 = vld [vmem:[%s1314_s9 + $0x2a0] sm:$0xff]  ;;  %v273_v33 = vld [vmem:[%s1314_s9 + $0x308] sm:$0xff]  ;;  %v275_v34 = vld [vmem:[%s1314_s9 + $0x318] sm:$0xff] }
  0x28   : > { %549 = vmatpush.bf16.msra.mxu0 %v1104_v18  ;;  %1116 = vmatpush.bf16.msra.mxu2 %v1104_v18  ;;  %v203_v18 = vld [vmem:[%s1314_s9 + $0xd8] sm:$0xff]  ;;  %v346_v28 = vpack.c.bf16 %v262_v25, %v260_v24  ;;  %v264_v36 = vld [vmem:[%s1314_s9 + $0x2c0] sm:$0xff]  ;;  %v266_v37 = vld [vmem:[%s1314_s9 + $0x2d0] sm:$0xff]  ;;  %v353_v38 = vpack.c.bf16 %v275_v34, %v273_v33 }
  0x29   : > { %v317_v19 = vpack.c.bf16 %v203_v18, %v201_v17  ;;  %v348_v40 = vpack.c.bf16 %v266_v37, %v264_v36  ;;  %v209_v41 = vld [vmem:[%s1314_s9 + $0x108] sm:$0xff]  ;;  %v204_v45 = vld [vmem:[%s1314_s9 + $0xe0] sm:$0xff]  ;;  %v206_v48 = vld [vmem:[%s1314_s9 + $0xf0] sm:$0xff] }
  0x2a   : > { %v277_v46 = vld [vmem:[%s1314_s9 + $0x328] sm:$0xff]  ;;  %v268_v49 = vld [vmem:[%s1314_s9 + $0x2e0] sm:$0xff]  ;;  %v270_v50 = vld [vmem:[%s1314_s9 + $0x2f0] sm:$0xff]  ;;  %v318_v52 = vpack.c.bf16 %v206_v48, %v204_v45 }
  0x2b   : > { %v350_v53 = vpack.c.bf16 %v270_v50, %v268_v49  ;;  %v215_v57 = vld [vmem:[%s1314_s9 + $0x138] sm:$0xff]  ;;  %v208_v60 = vld [vmem:[%s1314_s9 + $0x100] sm:$0xff]  ;;  %v281_v61 = vld [vmem:[%s1314_s9 + $0x348] sm:$0xff] }
  0x2c   : > { %550 = vmatpush.bf16.msra.mxu0 %v1103_v21  ;;  %1117 = vmatpush.bf16.msra.mxu2 %v1103_v21  ;;  %v269_v21 = vld [vmem:[%s1314_s9 + $0x2e8] sm:$0xff]  ;;  %v283_v62 = vld [vmem:[%s1314_s9 + $0x358] sm:$0xff]  ;;  %v210_v63 = vld [vmem:[%s1314_s9 + $0x110] sm:$0xff] }
  0x2d   : > { %1065 = vmatmul.msk.bf16.gmra.mxu1 %vm440_vm2, %v307_v22  ;;  %1082 = vmatmul.msk.bf16.gmra.mxu3 %vm440_vm2, %v341_v30  ;;  %v271_v22 = vld [vmem:[%s1314_s9 + $0x2f8] sm:$0xff]  ;;  %v272_v0 = vld [vmem:[%s1314_s9 + $0x300] sm:$0xff]  ;;  %v274_v1 = vld [vmem:[%s1314_s9 + $0x310] sm:$0xff]  ;;  %v320_v5 = vpack.c.bf16 %v210_v63, %v208_v60 }
  0x2e   : > { %v351_v26 = vpack.c.bf16 %v271_v22, %v269_v21  ;;  %v207_v30 = vld [vmem:[%s1314_s9 + $0xf8] sm:$0xff]  ;;  %v352_v6 = vpack.c.bf16 %v274_v1, %v272_v0  ;;  %v217_v13 = vld [vmem:[%s1314_s9 + $0x148] sm:$0xff]  ;;  %v276_v24 = vld [vmem:[%s1314_s9 + $0x320] sm:$0xff] }
  0x2f   : > { %v285_v21 = vld [vmem:[%s1314_s9 + $0x368] sm:$0xff]  ;;  %v287_v22 = vld [vmem:[%s1314_s9 + $0x378] sm:$0xff]  ;;  %v278_v25 = vld [vmem:[%s1314_s9 + $0x330] sm:$0xff] }
  0x30   : > { %551 = vmatpush.bf16.msra.mxu0 %v1102_v23  ;;  %1118 = vmatpush.bf16.msra.mxu2 %v1102_v23  ;;  %v198_v23 = vld [vmem:[%s1314_s9 + $0xb0] sm:$0xff]  ;;  %v221_v37 = vld [vmem:[%s1314_s9 + $0x168] sm:$0xff]  ;;  %v291_v48 = vld [vmem:[%s1314_s9 + $0x398] sm:$0xff] }
  0x31   : > { %v314_v27 = vpack.c.bf16 %v198_v23, %v196_v20  ;;  %v212_v20 = vld [vmem:[%s1314_s9 + $0x120] sm:$0xff]  ;;  %v214_v23 = vld [vmem:[%s1314_s9 + $0x130] sm:$0xff]  ;;  %v225_v1 = vld [vmem:[%s1314_s9 + $0x188] sm:$0xff] }
  0x32   : > { %v218_v49 = vld [vmem:[%s1314_s9 + $0x150] sm:$0xff]  ;;  %v280_v50 = vld [vmem:[%s1314_s9 + $0x340] sm:$0xff] }
  0x33   : > { %552 = vmatmul.bf16.vlgmr.msra.gmra.mxu0 %v304_v31  ;;  %632 = vmatmul.bf16.vlgmr.msra.gmra.mxu2 %v336_v32  ;;  %v319_v31 = vpack.c.bf16 %v207_v30, %v205_v29  ;;  %v200_v32 = vld [vmem:[%s1314_s9 + $0xc0] sm:$0xff]  ;;  %v322_v29 = vpack.c.bf16 %v214_v23, %v212_v20  ;;  %v354_v30 = vpack.c.bf16 %v278_v25, %v276_v24 }
  0x3d   : > { %1066 = vmatmul.msk.bf16.gmra.mxu1 %vm440_vm2, %v309_v35  ;;  %1083 = vmatmul.msk.bf16.gmra.mxu3 %vm440_vm2, %v343_v42  ;;  %v202_v35 = vld [vmem:[%s1314_s9 + $0xd0] sm:$0xff]  ;;  %v211_v42 = vld [vmem:[%s1314_s9 + $0x118] sm:$0xff] }
  0x3e   : > { %v316_v39 = vpack.c.bf16 %v202_v35, %v200_v32 }
  0x43   : > { %557 = vmatmul.bf16.gmra.mxu0 %v306_v43  ;;  %637 = vmatmul.bf16.gmra.mxu2 %v338_v44  ;;  %v321_v43 = vpack.c.bf16 %v211_v42, %v209_v41 }
  0x4d   : > { %1067 = vmatmul.msk.bf16.gmra.mxu1 %vm440_vm2, %v311_v47  ;;  %1084 = vmatmul.msk.bf16.gmra.mxu3 %vm440_vm2, %v345_v54  ;;  %v279_v47 = vld [vmem:[%s1314_s9 + $0x338] sm:$0xff] }
  0x4e   : > { %v355_v51 = vpack.c.bf16 %v279_v47, %v277_v46  ;;  %v216_v46 = vld [vmem:[%s1314_s9 + $0x140] sm:$0xff]  ;;  %v289_v47 = vld [vmem:[%s1314_s9 + $0x388] sm:$0xff] }
  0x53   : > { %562 = vmatmul.bf16.gmra.mxu0 %v308_v55  ;;  %642 = vmatmul.bf16.gmra.mxu2 %v340_v56  ;;  %v213_v56 = vld [vmem:[%s1314_s9 + $0x128] sm:$0xff] }
  0x54   : > { %v323_v58 = vpack.c.bf16 %v215_v57, %v213_v56  ;;  %v324_v56 = vpack.c.bf16 %v218_v49, %v216_v46  ;;  %v288_v46 = vld [vmem:[%s1314_s9 + $0x380] sm:$0xff] }
  0x5d   : > { %1068 = vmatmul.msk.bf16.gmra.mxu1 %vm440_vm2, %v313_v59  ;;  %1085 = vmatmul.msk.bf16.gmra.mxu3 %vm440_vm2, %v347_v2 }
  0x63   : > { %567 = vmatmul.bf16.gmra.mxu0 %v310_v3  ;;  %647 = vmatmul.bf16.gmra.mxu2 %v342_v4  ;;  %v1434_v3 = vld [vmem:[%s1710_s2] ss:$0 sm:$0xff]  ;;  %v357_v4 = vpack.c.bf16 %v283_v62, %v281_v61 }
  0x6d   : > { %1069 = vmatmul.msk.bf16.gmra.mxu1 %vm440_vm2, %v315_v7  ;;  %1086 = vmatmul.msk.bf16.gmra.mxu3 %vm440_vm2, %v349_v14  ;;  %v219_v14 = vld [vmem:[%s1314_s9 + $0x158] sm:$0xff] }
  0x6e   : > { %v325_v17 = vpack.c.bf16 %v219_v14, %v217_v13  ;;  %v220_v13 = vld [vmem:[%s1314_s9 + $0x160] sm:$0xff]  ;;  %v293_v14 = vld [vmem:[%s1314_s9 + $0x3a8] sm:$0xff] }
  0x73   : > { %572 = vmatmul.bf16.gmra.mxu0 %v312_v15  ;;  %652 = vmatmul.bf16.gmra.mxu2 %v344_v16 }
  0x7d   : > { %1070 = vmatmul.msk.bf16.gmra.mxu1 %vm440_vm2, %v317_v19  ;;  %1087 = vmatmul.msk.bf16.gmra.mxu3 %vm440_vm2, %v351_v26 }
  0x83   : > { %577 = vmatmul.bf16.gmra.mxu0 %v314_v27  ;;  %657 = vmatmul.bf16.gmra.mxu2 %v346_v28  ;;  %v359_v27 = vpack.c.bf16 %v287_v22, %v285_v21 }
  0x8d   : > { %1071 = vmatmul.msk.bf16.gmra.mxu1 %vm440_vm2, %v319_v31  ;;  %1088 = vmatmul.msk.bf16.gmra.mxu3 %vm440_vm2, %v353_v38  ;;  %v223_v38 = vld [vmem:[%s1314_s9 + $0x178] sm:$0xff] }
  0x93   : > { %582 = vmatmul.bf16.gmra.mxu0 %v316_v39  ;;  %662 = vmatmul.bf16.gmra.mxu2 %v348_v40 }
  0x9a   : > { %v722_v44 = vpop.f32.mrf.mxu1 }
  0x9d   : > { %1072 = vmatmul.msk.bf16.gmra.mxu1 %vm440_vm2, %v321_v43  ;;  %1089 = vmatmul.msk.bf16.gmra.mxu3 %vm440_vm2, %v355_v51  ;;  %v327_v43 = vpack.c.bf16 %v223_v38, %v221_v37  ;;  %v282_v51 = vld [vmem:[%s1314_s9 + $0x350] sm:$0xff] }
  0x9e   : > { %v356_v57 = vpack.c.bf16 %v282_v51, %v280_v50 }
  0xa0   : > { %v1417_v55 = vpop.f32.mrf.mxu3 }
  0xa2   : > { %v724_v54 = vpop.f32.mrf.mxu1 }
  0xa3   : > { %587 = vmatmul.bf16.gmra.mxu0 %v318_v52  ;;  %667 = vmatmul.bf16.gmra.mxu2 %v350_v53  ;;  %v361_v53 = vpack.c.bf16 %v291_v48, %v289_v47  ;;  %v290_v47 = vld [vmem:[%s1314_s9 + $0x390] sm:$0xff] }
  0xa8   : > { %v1428_v2 = vpop.f32.mrf.mxu3 }
  0xaa   : > { %v727_v59 = vpop.f32.mrf.mxu1 }
  0xad   : > { %1073 = vmatmul.msk.bf16.gmra.mxu1 %vm440_vm2, %v323_v58  ;;  %1090 = vmatmul.msk.bf16.gmra.mxu3 %vm440_vm2, %v357_v4 }
  0xb0   : > { %v553_v7 = vpop.f32.mrf.mxu0  ;;  %v1440_v11 = vpop.f32.mrf.mxu3 }
  0xb1   : > { %v554_v8 = vadd.f32 %v1434_v3, %v553_v7 }
  0xb2   : > { %v729_v9 = vpop.f32.mrf.mxu1 }
  0xb3   : > { %v723_v10 = vadd.f32 %v722_v44, %v554_v8  ;;  %592 = vmatmul.bf16.gmra.mxu0 %v320_v5  ;;  %672 = vmatmul.bf16.gmra.mxu2 %v352_v6 }
  0xb5   : > { %882 = vst [vmem:[%s1442_s6] sm:$0xff] %v723_v10 }
  0xb6   : > { %v1445_v12 = vpop.f32.mrf.mxu2 }
  0xb8   : > { %v555_v15 = vpop.f32.mrf.mxu0  ;;  %v1456_v26 = vpop.f32.mrf.mxu3 }
  0xb9   : > { %v556_v16 = vadd.f32 %v1434_v3, %v555_v15  ;;  %v295_v15 = vld [vmem:[%s1314_s9 + $0x3b8] sm:$0xff] }
  0xba   : > { %v732_v18 = vpop.f32.mrf.mxu1 }
  0xbb   : > { %v725_v19 = vadd.f32 %v724_v54, %v556_v16  ;;  %v222_v16 = vld [vmem:[%s1314_s9 + $0x170] sm:$0xff] }
  0xbc   : > { %v326_v22 = vpack.c.bf16 %v222_v16, %v220_v13  ;;  %v292_v13 = vld [vmem:[%s1314_s9 + $0x3a0] sm:$0xff] }
  0xbd   : > { %883 = vst [vmem:[%s1442_s6 + $0x8] sm:$0xff] %v725_v19  ;;  %1074 = vmatmul.msk.bf16.gmra.mxu1 %vm440_vm2, %v325_v17  ;;  %1091 = vmatmul.msk.bf16.gmra.mxu3 %vm440_vm2, %v359_v27  ;;  %v284_v17 = vld [vmem:[%s1314_s9 + $0x360] sm:$0xff] }
  0xbe   : > { %v1460_v28 = vpop.f32.mrf.mxu2 }
  0xc0   : > { %v558_v31 = vpop.f32.mrf.mxu0  ;;  %v1464_v35 = vpop.f32.mrf.mxu3 }
  0xc1   : > { %v559_v32 = vadd.f32 %v1434_v3, %v558_v31 }
  0xc2   : > { %v734_v33 = vpop.f32.mrf.mxu1 }
  0xc3   : > { %v728_v34 = vadd.f32 %v727_v59, %v559_v32  ;;  %597 = vmatmul.bf16.gmra.mxu0 %v322_v29  ;;  %677 = vmatmul.bf16.gmra.mxu2 %v354_v30 }
  0xc5   : > { %884 = vst [vmem:[%s1442_s6 + $0x10] sm:$0xff] %v728_v34 }
  0xc6   : > { %v638_v36 = vpop.f32.mrf.mxu2 }
  0xc7   : > { %v639_v39 = vadd.f32 %v1434_v3, %v638_v36 }
  0xc8   : > { %v560_v40 = vpop.f32.mrf.mxu0  ;;  %v1479_v52 = vpop.f32.mrf.mxu3 }
  0xc9   : > { %v808_v41 = vadd.f32 %v1417_v55, %v639_v39  ;;  %v561_v42 = vadd.f32 %v1434_v3, %v560_v40 }
  0xca   : > { %v737_v44 = vpop.f32.mrf.mxu1 }
  0xcb   : > { %916 = vst [vmem:[%s1442_s6 + $0x110] sm:$0xff] %v808_v41  ;;  %v730_v45 = vadd.f32 %v729_v9, %v561_v42  ;;  %v224_v42 = vld [vmem:[%s1314_s9 + $0x180] sm:$0xff] }
  0xcd   : > { %885 = vst [vmem:[%s1442_s6 + $0x18] sm:$0xff] %v730_v45  ;;  %1075 = vmatmul.msk.bf16.gmra.mxu1 %vm440_vm2, %v327_v43  ;;  %1092 = vmatmul.msk.bf16.gmra.mxu3 %vm440_vm2, %v361_v53  ;;  %v297_v43 = vld [vmem:[%s1314_s9 + $0x3c8] sm:$0xff]  ;;  %v226_v45 = vld [vmem:[%s1314_s9 + $0x190] sm:$0xff]  ;;  %v360_v53 = vpack.c.bf16 %v290_v47, %v288_v46 }
  0xce   : > { %v640_v54 = vpop.f32.mrf.mxu2  ;;  %v328_v51 = vpack.c.bf16 %v226_v45, %v224_v42 }
  0xcf   : > { %v641_v55 = vadd.f32 %v1434_v3, %v640_v54 }
  0xd0   : > { %v563_v58 = vpop.f32.mrf.mxu0  ;;  %v1488_v63 = vpop.f32.mrf.mxu3 }
  0xd1   : > { %v810_v59 = vadd.f32 %v1428_v2, %v641_v55  ;;  %v564_v60 = vadd.f32 %v1434_v3, %v563_v58  ;;  %v227_v2 = vld [vmem:[%s1314_s9 + $0x198] sm:$0xff] }
  0xd2   : > { %v739_v61 = vpop.f32.mrf.mxu1  ;;  %v329_v8 = vpack.c.bf16 %v227_v2, %v225_v1 }
  0xd3   : > { %917 = vst [vmem:[%s1442_s6 + $0x118] sm:$0xff] %v810_v59  ;;  %v733_v62 = vadd.f32 %v732_v18, %v564_v60  ;;  %602 = vmatmul.bf16.gmra.mxu0 %v324_v56  ;;  %682 = vmatmul.bf16.gmra.mxu2 %v356_v57  ;;  %v286_v18 = vld [vmem:[%s1314_s9 + $0x370] sm:$0xff] }
  0xd4   : > { %v358_v23 = vpack.c.bf16 %v286_v18, %v284_v17 }
  0xd5   : > { %886 = vst [vmem:[%s1442_s6 + $0x20] sm:$0xff] %v733_v62 }
  0xd6   : > { %v643_v0 = vpop.f32.mrf.mxu2 }
  0xd7   : > { %v644_v4 = vadd.f32 %v1434_v3, %v643_v0 }
  0xd8   : > { %v565_v5 = vpop.f32.mrf.mxu0  ;;  %v1503_v19 = vpop.f32.mrf.mxu3 }
  0xd9   : > { %v813_v6 = vadd.f32 %v1440_v11, %v644_v4  ;;  %v566_v7 = vadd.f32 %v1434_v3, %v565_v5  ;;  %v363_v11 = vpack.c.bf16 %v295_v15, %v293_v14  ;;  %v294_v14 = vld [vmem:[%s1314_s9 + $0x3b0] sm:$0xff] }
  0xda   : > { %v742_v9 = vpop.f32.mrf.mxu1 }
  0xdb   : > { %918 = vst [vmem:[%s1442_s6 + $0x120] sm:$0xff] %v813_v6  ;;  %v735_v10 = vadd.f32 %v734_v33, %v566_v7  ;;  %v231_v33 = vld [vmem:[%s1314_s9 + $0x1b8] sm:$0xff]  ;;  %v228_v7 = vld [vmem:[%s1314_s9 + $0x1a0] sm:$0xff] }
  0xdd   : > { %887 = vst [vmem:[%s1442_s6 + $0x28] sm:$0xff] %v735_v10  ;;  %1076 = vmatmul.msk.bf16.gmra.mxu1 %vm440_vm2, %v329_v8  ;;  %1093 = vmatmul.msk.bf16.gmra.mxu3 %vm440_vm2, %v363_v11  ;;  %v301_v8 = vld [vmem:[%s1314_s9 + $0x3e8] sm:$0xff]  ;;  %v230_v10 = vld [vmem:[%s1314_s9 + $0x1b0] sm:$0xff]  ;;  %v362_v11 = vpack.c.bf16 %v294_v14, %v292_v13 }
  0xde   : > { %v645_v20 = vpop.f32.mrf.mxu2  ;;  %v330_v18 = vpack.c.bf16 %v230_v10, %v228_v7 }
  0xdf   : > { %v646_v21 = vadd.f32 %v1434_v3, %v645_v20 }
  0xe0   : > { %v568_v24 = vpop.f32.mrf.mxu0  ;;  %v1512_v31 = vpop.f32.mrf.mxu3 }
  0xe1   : > { %v815_v25 = vadd.f32 %v1456_v26, %v646_v21  ;;  %v569_v27 = vadd.f32 %v1434_v3, %v568_v24  ;;  %v229_v26 = vld [vmem:[%s1314_s9 + $0x1a8] sm:$0xff] }
  0xe2   : > { %v744_v29 = vpop.f32.mrf.mxu1  ;;  %v331_v39 = vpack.c.bf16 %v231_v33, %v229_v26 }
  0xe3   : > { %919 = vst [vmem:[%s1442_s6 + $0x128] sm:$0xff] %v815_v25  ;;  %v738_v30 = vadd.f32 %v737_v44, %v569_v27  ;;  %607 = vmatmul.bf16.gmra.mxu0 %v326_v22  ;;  %687 = vmatmul.bf16.gmra.mxu2 %v358_v23  ;;  %v299_v44 = vld [vmem:[%s1314_s9 + $0x3d8] sm:$0xff]  ;;  %v237_v27 = vld [vmem:[%s1314_s9 + $0x1e8] sm:$0xff] }
  0xe5   : > { %888 = vst [vmem:[%s1442_s6 + $0x30] sm:$0xff] %v738_v30 }
  0xe6   : > { %v648_v32 = vpop.f32.mrf.mxu2 }
  0xe7   : > { %v649_v34 = vadd.f32 %v1434_v3, %v648_v32 }
  0xe8   : > { %v570_v36 = vpop.f32.mrf.mxu0  ;;  %v1527_v48 = vpop.f32.mrf.mxu3 }
  0xe9   : > { %v818_v37 = vadd.f32 %v1464_v35, %v649_v34  ;;  %v571_v38 = vadd.f32 %v1434_v3, %v570_v36  ;;  %v365_v35 = vpack.c.bf16 %v299_v44, %v297_v43 }
  0xea   : > { %v747_v40 = vpop.f32.mrf.mxu1 }
  0xeb   : > { %920 = vst [vmem:[%s1442_s6 + $0x130] sm:$0xff] %v818_v37  ;;  %v740_v41 = vadd.f32 %v739_v61, %v571_v38  ;;  %v235_v61 = vld [vmem:[%s1314_s9 + $0x1d8] sm:$0xff]  ;;  %v232_v38 = vld [vmem:[%s1314_s9 + $0x1c0] sm:$0xff] }
  0xed   : > { %889 = vst [vmem:[%s1442_s6 + $0x38] sm:$0xff] %v740_v41  ;;  %1077 = vmatmul.msk.bf16.gmra.mxu1 %vm440_vm2, %v331_v39  ;;  %1094 = vmatmul.msk.bf16.gmra.mxu3 %vm440_vm2, %v365_v35  ;;  %v234_v39 = vld [vmem:[%s1314_s9 + $0x1d0] sm:$0xff] }
  0xee   : > { %v650_v49 = vpop.f32.mrf.mxu2  ;;  %v298_v41 = vld [vmem:[%s1314_s9 + $0x3d0] sm:$0xff]  ;;  %v332_v43 = vpack.c.bf16 %v234_v39, %v232_v38 }
  0xef   : > { %v651_v50 = vadd.f32 %v1434_v3, %v650_v49 }
  0xf0   : > { %v573_v54 = vpop.f32.mrf.mxu0  ;;  %v1536_v59 = vpop.f32.mrf.mxu3 }
  0xf1   : > { %v820_v55 = vadd.f32 %v1479_v52, %v651_v50  ;;  %v574_v56 = vadd.f32 %v1434_v3, %v573_v54  ;;  %v233_v52 = vld [vmem:[%s1314_s9 + $0x1c8] sm:$0xff]  ;;  %v243_v54 = vld [vmem:[%s1314_s9 + $0x218] sm:$0xff] }
  0xf2   : > { %v749_v57 = vpop.f32.mrf.mxu1  ;;  %v333_v4 = vpack.c.bf16 %v235_v61, %v233_v52 }
  0xf3   : > { %921 = vst [vmem:[%s1442_s6 + $0x138] sm:$0xff] %v820_v55  ;;  %v743_v58 = vadd.f32 %v742_v9, %v574_v56  ;;  %612 = vmatmul.bf16.gmra.mxu0 %v328_v51  ;;  %692 = vmatmul.bf16.gmra.mxu2 %v360_v53  ;;  %v303_v9 = vld [vmem:[%s1314_s9 + $0x3f8] sm:$0xff]  ;;  %v241_v53 = vld [vmem:[%s1314_s9 + $0x208] sm:$0xff] }
  0xf5   : > { %890 = vst [vmem:[%s1442_s6 + $0x40] sm:$0xff] %v743_v58  ;;  %v337_v58 = vpack.c.bf16 %v243_v54, %v241_v53 }
  0xf6   : > { %v653_v60 = vpop.f32.mrf.mxu2 }
  0xf7   : > { %v654_v62 = vadd.f32 %v1434_v3, %v653_v60 }
  0xf8   : > { %v575_v0 = vpop.f32.mrf.mxu0  ;;  %v1551_v15 = vpop.f32.mrf.mxu3 }
  0xf9   : > { %v823_v1 = vadd.f32 %v1488_v63, %v654_v62  ;;  %v576_v2 = vadd.f32 %v1434_v3, %v575_v0  ;;  %v367_v63 = vpack.c.bf16 %v303_v9, %v301_v8  ;;  %v236_v62 = vld [vmem:[%s1314_s9 + $0x1e0] sm:$0xff]  ;;  %v238_v0 = vld [vmem:[%s1314_s9 + $0x1f0] sm:$0xff] }
  0xfa   : > { %v752_v5 = vpop.f32.mrf.mxu1 }
  0xfb   : > { %922 = vst [vmem:[%s1442_s6 + $0x140] sm:$0xff] %v823_v1  ;;  %v745_v6 = vadd.f32 %v744_v29, %v576_v2  ;;  %v239_v29 = vld [vmem:[%s1314_s9 + $0x1f8] sm:$0xff]  ;;  %v300_v1 = vld [vmem:[%s1314_s9 + $0x3e0] sm:$0xff]  ;;  %v302_v2 = vld [vmem:[%s1314_s9 + $0x3f0] sm:$0xff] }
  0xfc   : > { %v335_v34 = vpack.c.bf16 %v239_v29, %v237_v27 }
  0xfd   : > { %891 = vst [vmem:[%s1442_s6 + $0x48] sm:$0xff] %v745_v6  ;;  %1078 = vmatmul.msk.bf16.gmra.mxu1 %vm440_vm2, %v333_v4  ;;  %1095 = vmatmul.msk.bf16.gmra.mxu3 %vm440_vm2, %v367_v63  ;;  %v366_v6 = vpack.c.bf16 %v302_v2, %v300_v1 }
  0xfe   : > { %v655_v16 = vpop.f32.mrf.mxu2 }
  0xff   : > { %v656_v17 = vadd.f32 %v1434_v3, %v655_v16 }
 0x100   : > { %v578_v20 = vpop.f32.mrf.mxu0 }
 0x101   : > { %v825_v21 = vadd.f32 %v1503_v19, %v656_v17  ;;  %v579_v22 = vadd.f32 %v1434_v3, %v578_v20  ;;  %v1563_v19 = vpop.f32.mrf.mxu3 }
 0x102   : > { %v754_v23 = vpop.f32.mrf.mxu1 }
 0x103   : > { %923 = vst [vmem:[%s1442_s6 + $0x148] sm:$0xff] %v825_v21  ;;  %v748_v24 = vadd.f32 %v747_v40, %v579_v22  ;;  %617 = vmatmul.bf16.gmra.mxu0 %v330_v18  ;;  %697 = vmatmul.bf16.gmra.mxu2 %v362_v11  ;;  %v296_v40 = vld [vmem:[%s1314_s9 + $0x3c0] sm:$0xff] }
 0x104   : > { %v364_v44 = vpack.c.bf16 %v298_v41, %v296_v40 }
 0x105   : > { %892 = vst [vmem:[%s1442_s6 + $0x50] sm:$0xff] %v748_v24 }
 0x106   : > { %v658_v25 = vpop.f32.mrf.mxu2 }
 0x107   : > { %v659_v30 = vadd.f32 %v1434_v3, %v658_v25 }
 0x108   : > { %v580_v32 = vpop.f32.mrf.mxu0 }
 0x109   : > { %v828_v26 = vadd.f32 %v1512_v31, %v659_v30  ;;  %v581_v33 = vadd.f32 %v1434_v3, %v580_v32  ;;  %v839_v46 = vpop.f32.mrf.mxu3 }
 0x10a   : > { %v757_v36 = vpop.f32.mrf.mxu1 }
 0x10b   : > { %924 = vst [vmem:[%s1442_s6 + $0x150] sm:$0xff] %v828_v26  ;;  %v750_v37 = vadd.f32 %v749_v57, %v581_v33 }
 0x10d   : > { %893 = vst [vmem:[%s1442_s6 + $0x58] sm:$0xff] %v750_v37  ;;  %1079 = vmatmul.msk.bf16.gmra.mxu1 %vm440_vm2, %v335_v34 }
 0x10e   : > { %v660_v42 = vpop.f32.mrf.mxu2 }
 0x10f   : > { %v661_v31 = vadd.f32 %v1434_v3, %v660_v42 }
 0x110   : > { %v583_v45 = vpop.f32.mrf.mxu0 }
 0x111   : > { %v830_v47 = vadd.f32 %v1527_v48, %v661_v31  ;;  %v584_v35 = vadd.f32 %v1434_v3, %v583_v45  ;;  %v842_v52 = vpop.f32.mrf.mxu3 }
 0x112   : > { %v759_v49 = vpop.f32.mrf.mxu1 }
 0x113   : > { %925 = vst [vmem:[%s1442_s6 + $0x158] sm:$0xff] %v830_v47  ;;  %v753_v50 = vadd.f32 %v752_v5, %v584_v35  ;;  %622 = vmatmul.bf16.gmra.mxu0 %v332_v43  ;;  %702 = vmatmul.bf16.gmra.mxu2 %v364_v44 }
 0x115   : > { %894 = vst [vmem:[%s1442_s6 + $0x60] sm:$0xff] %v753_v50 }
 0x116   : > { %v663_v51 = vpop.f32.mrf.mxu2 }
 0x117   : > { %v664_v55 = vadd.f32 %v1434_v3, %v663_v51 }
 0x118   : > { %v585_v48 = vpop.f32.mrf.mxu0 }
 0x119   : > { %v833_v56 = vadd.f32 %v1536_v59, %v664_v55  ;;  %v586_v57 = vadd.f32 %v1434_v3, %v585_v48  ;;  %v334_v59 = vpack.c.bf16 %v238_v0, %v236_v62  ;;  %v844_v14 = vpop.f32.mrf.mxu3 }
 0x11a   : > { %v762_v60 = vpop.f32.mrf.mxu1 }
 0x11b   : > { %926 = vst [vmem:[%s1442_s6 + $0x160] sm:$0xff] %v833_v56  ;;  %v755_v61 = vadd.f32 %v754_v23, %v586_v57 }
 0x11d   : > { %895 = vst [vmem:[%s1442_s6 + $0x68] sm:$0xff] %v755_v61  ;;  %1080 = vmatmul.msk.bf16.gmra.mxu1 %vm440_vm2, %v337_v58 }
 0x11e   : > { %v665_v4 = vpop.f32.mrf.mxu2 }
 0x11f   : > { %v666_v5 = vadd.f32 %v1434_v3, %v665_v4 }
 0x120   : > { %v588_v7 = vpop.f32.mrf.mxu0 }
 0x121   : > { %v835_v8 = vadd.f32 %v1551_v15, %v666_v5  ;;  %v589_v9 = vadd.f32 %v1434_v3, %v588_v7  ;;  %v847_v22 = vpop.f32.mrf.mxu3 }
 0x122   : > { %v764_v10 = vpop.f32.mrf.mxu1 }
 0x123   : > { %927 = vst [vmem:[%s1442_s6 + $0x168] sm:$0xff] %v835_v8  ;;  %v758_v13 = vadd.f32 %v757_v36, %v589_v9  ;;  %627 = vmatmul.bf16.gmra.mxu0 %v334_v59  ;;  %707 = vmatmul.bf16.gmra.mxu2 %v366_v6 }
 0x125   : > { %896 = vst [vmem:[%s1442_s6 + $0x70] sm:$0xff] %v758_v13 }
 0x126   : > { %v668_v63 = vpop.f32.mrf.mxu2 }
 0x127   : > { %v669_v16 = vadd.f32 %v1434_v3, %v668_v63 }
 0x128   : > { %v590_v17 = vpop.f32.mrf.mxu0 }
 0x129   : > { %v838_v18 = vadd.f32 %v1563_v19, %v669_v16  ;;  %v591_v15 = vadd.f32 %v1434_v3, %v590_v17  ;;  %v849_v33 = vpop.f32.mrf.mxu3 }
 0x12a   : > { %v767_v11 = vpop.f32.mrf.mxu1 }
 0x12b   : > { %928 = vst [vmem:[%s1442_s6 + $0x170] sm:$0xff] %v838_v18  ;;  %v760_v20 = vadd.f32 %v759_v49, %v591_v15 }
 0x12d   : > { %897 = vst [vmem:[%s1442_s6 + $0x78] sm:$0xff] %v760_v20 }
 0x12e   : > { %v670_v21 = vpop.f32.mrf.mxu2 }
 0x12f   : > { %v671_v23 = vadd.f32 %v1434_v3, %v670_v21 }
 0x130   : > { %v593_v24 = vpop.f32.mrf.mxu0 }
 0x131   : > { %v840_v25 = vadd.f32 %v839_v46, %v671_v23  ;;  %v594_v27 = vadd.f32 %v1434_v3, %v593_v24  ;;  %v852_v44 = vpop.f32.mrf.mxu3 }
 0x132   : > { %v769_v29 = vpop.f32.mrf.mxu1 }
 0x133   : > { %929 = vst [vmem:[%s1442_s6 + $0x178] sm:$0xff] %v840_v25  ;;  %v763_v30 = vadd.f32 %v762_v60, %v594_v27 }
 0x135   : > { %898 = vst [vmem:[%s1442_s6 + $0x80] sm:$0xff] %v763_v30 }
 0x136   : > { %v673_v19 = vpop.f32.mrf.mxu2 }
 0x137   : > { %v674_v32 = vadd.f32 %v1434_v3, %v673_v19 }
 0x138   : > { %v595_v26 = vpop.f32.mrf.mxu0 }
 0x139   : > { %v843_v34 = vadd.f32 %v842_v52, %v674_v32  ;;  %v596_v36 = vadd.f32 %v1434_v3, %v595_v26  ;;  %v854_v54 = vpop.f32.mrf.mxu3 }
 0x13a   : > { %v772_v37 = vpop.f32.mrf.mxu1 }
 0x13b   : > { %930 = vst [vmem:[%s1442_s6 + $0x180] sm:$0xff] %v843_v34  ;;  %v765_v38 = vadd.f32 %v764_v10, %v596_v36 }
 0x13d   : > { %899 = vst [vmem:[%s1442_s6 + $0x88] sm:$0xff] %v765_v38 }
 0x13e   : > { %v675_v39 = vpop.f32.mrf.mxu2 }
 0x13f   : > { %v676_v40 = vadd.f32 %v1434_v3, %v675_v39 }
 0x140   : > { %v598_v41 = vpop.f32.mrf.mxu0 }
 0x141   : > { %v845_v42 = vadd.f32 %v844_v14, %v676_v40  ;;  %v599_v31 = vadd.f32 %v1434_v3, %v598_v41  ;;  %v857_v62 = vpop.f32.mrf.mxu3 }
 0x142   : > { %v774_v43 = vpop.f32.mrf.mxu1 }
 0x143   : > { %931 = vst [vmem:[%s1442_s6 + $0x188] sm:$0xff] %v845_v42  ;;  %v768_v45 = vadd.f32 %v767_v11, %v599_v31 }
 0x145   : > { %900 = vst [vmem:[%s1442_s6 + $0x90] sm:$0xff] %v768_v45 }
 0x146   : > { %v678_v46 = vpop.f32.mrf.mxu2 }
 0x147   : > { %v679_v47 = vadd.f32 %v1434_v3, %v678_v46 }
 0x148   : > { %v600_v35 = vpop.f32.mrf.mxu0 }
 0x149   : > { %v848_v49 = vadd.f32 %v847_v22, %v679_v47  ;;  %v601_v50 = vadd.f32 %v1434_v3, %v600_v35  ;;  %v859_v9 = vpop.f32.mrf.mxu3 }
 0x14a   : > { %v777_v51 = vpop.f32.mrf.mxu1 }
 0x14b   : > { %932 = vst [vmem:[%s1442_s6 + $0x190] sm:$0xff] %v848_v49  ;;  %v770_v53 = vadd.f32 %v769_v29, %v601_v50 }
 0x14d   : > { %901 = vst [vmem:[%s1442_s6 + $0x98] sm:$0xff] %v770_v53 }
 0x14e   : > { %v680_v55 = vpop.f32.mrf.mxu2 }
 0x14f   : > { %v681_v48 = vadd.f32 %v1434_v3, %v680_v55 }
 0x150   : > { %v603_v56 = vpop.f32.mrf.mxu0 }
 0x151   : > { %v850_v57 = vadd.f32 %v849_v33, %v681_v48  ;;  %v604_v58 = vadd.f32 %v1434_v3, %v603_v56  ;;  %v862_v21 = vpop.f32.mrf.mxu3 }
 0x152   : > { %v779_v60 = vpop.f32.mrf.mxu1 }
 0x153   : > { %933 = vst [vmem:[%s1442_s6 + $0x198] sm:$0xff] %v850_v57  ;;  %v773_v52 = vadd.f32 %v772_v37, %v604_v58 }
 0x155   : > { %902 = vst [vmem:[%s1442_s6 + $0xa0] sm:$0xff] %v773_v52 }
 0x156   : > { %v683_v61 = vpop.f32.mrf.mxu2 }
 0x157   : > { %v684_v0 = vadd.f32 %v1434_v3, %v683_v61 }
 0x158   : > { %v605_v1 = vpop.f32.mrf.mxu0 }
 0x159   : > { %v853_v2 = vadd.f32 %v852_v44, %v684_v0  ;;  %v606_v4 = vadd.f32 %v1434_v3, %v605_v1  ;;  %v864_v32 = vpop.f32.mrf.mxu3 }
 0x15a   : > { %v782_v5 = vpop.f32.mrf.mxu1 }
 0x15b   : > { %934 = vst [vmem:[%s1442_s6 + $0x1a0] sm:$0xff] %v853_v2  ;;  %v775_v59 = vadd.f32 %v774_v43, %v606_v4  ;;  %v634_v4 = vadd.f32 %v1434_v3, %v1445_v12  ;;  %v636_v12 = vadd.f32 %v1434_v3, %v1460_v28 }
 0x15d   : > { %903 = vst [vmem:[%s1442_s6 + $0xa8] sm:$0xff] %v775_v59 }
 0x15e   : > { %v685_v6 = vpop.f32.mrf.mxu2 }
 0x15f   : > { %v686_v7 = vadd.f32 %v1434_v3, %v685_v6 }
 0x160   : > { %v608_v8 = vpop.f32.mrf.mxu0 }
 0x161   : > { %v855_v10 = vadd.f32 %v854_v54, %v686_v7  ;;  %v609_v13 = vadd.f32 %v1434_v3, %v608_v8  ;;  %v867_v41 = vpop.f32.mrf.mxu3 }
 0x162   : > { %v784_v14 = vpop.f32.mrf.mxu1 }
 0x163   : > { %935 = vst [vmem:[%s1442_s6 + $0x1a8] sm:$0xff] %v855_v10  ;;  %v778_v63 = vadd.f32 %v777_v51, %v609_v13 }
 0x165   : > { %904 = vst [vmem:[%s1442_s6 + $0xb0] sm:$0xff] %v778_v63 }
 0x166   : > { %v688_v16 = vpop.f32.mrf.mxu2 }
 0x167   : > { %v689_v17 = vadd.f32 %v1434_v3, %v688_v16 }
 0x168   : > { %v610_v18 = vpop.f32.mrf.mxu0 }
 0x169   : > { %v858_v15 = vadd.f32 %v857_v62, %v689_v17  ;;  %v611_v11 = vadd.f32 %v1434_v3, %v610_v18  ;;  %v869_v50 = vpop.f32.mrf.mxu3 }
 0x16a   : > { %v787_v20 = vpop.f32.mrf.mxu1 }
 0x16b   : > { %936 = vst [vmem:[%s1442_s6 + $0x1b0] sm:$0xff] %v858_v15  ;;  %v780_v22 = vadd.f32 %v779_v60, %v611_v11 }
 0x16d   : > { %905 = vst [vmem:[%s1442_s6 + $0xb8] sm:$0xff] %v780_v22 }
 0x16e   : > { %v690_v23 = vpop.f32.mrf.mxu2 }
 0x16f   : > { %v691_v24 = vadd.f32 %v1434_v3, %v690_v23 }
 0x170   : > { %v613_v25 = vpop.f32.mrf.mxu0 }
 0x171   : > { %v860_v27 = vadd.f32 %v859_v9, %v691_v24  ;;  %v614_v29 = vadd.f32 %v1434_v3, %v613_v25  ;;  %v872_v61 = vpop.f32.mrf.mxu3 }
 0x172   : > { %v789_v30 = vpop.f32.mrf.mxu1 }
 0x173   : > { %937 = vst [vmem:[%s1442_s6 + $0x1b8] sm:$0xff] %v860_v27  ;;  %v783_v19 = vadd.f32 %v782_v5, %v614_v29 }
 0x175   : > { %906 = vst [vmem:[%s1442_s6 + $0xc0] sm:$0xff] %v783_v19 }
 0x176   : > { %v693_v26 = vpop.f32.mrf.mxu2 }
 0x177   : > { %v694_v33 = vadd.f32 %v1434_v3, %v693_v26 }
 0x178   : > { %v615_v34 = vpop.f32.mrf.mxu0 }
 0x179   : > { %v863_v36 = vadd.f32 %v862_v21, %v694_v33  ;;  %v616_v37 = vadd.f32 %v1434_v3, %v615_v34  ;;  %v874_v9 = vpop.f32.mrf.mxu3 }
 0x17a   : > { %v792_v38 = vpop.f32.mrf.mxu1 }
 0x17b   : > { %938 = vst [vmem:[%s1442_s6 + $0x1c0] sm:$0xff] %v863_v36  ;;  %v785_v39 = vadd.f32 %v784_v14, %v616_v37 }
 0x17d   : > { %907 = vst [vmem:[%s1442_s6 + $0xc8] sm:$0xff] %v785_v39 }
 0x17e   : > { %v695_v40 = vpop.f32.mrf.mxu2 }
 0x17f   : > { %v696_v42 = vadd.f32 %v1434_v3, %v695_v40 }
 0x180   : > { %v618_v31 = vpop.f32.mrf.mxu0 }
 0x181   : > { %v865_v43 = vadd.f32 %v864_v32, %v696_v42  ;;  %v619_v44 = vadd.f32 %v1434_v3, %v618_v31  ;;  %v877_v11 = vpop.f32.mrf.mxu3 }
 0x182   : > { %v794_v45 = vpop.f32.mrf.mxu1 }
 0x183   : > { %939 = vst [vmem:[%s1442_s6 + $0x1c8] sm:$0xff] %v865_v43  ;;  %v788_v46 = vadd.f32 %v787_v20, %v619_v44 }
 0x185   : > { %908 = vst [vmem:[%s1442_s6 + $0xd0] sm:$0xff] %v788_v46 }
 0x186   : > { %v698_v47 = vpop.f32.mrf.mxu2 }
 0x187   : > { %v699_v35 = vadd.f32 %v1434_v3, %v698_v47 }
 0x188   : > { %v620_v49 = vpop.f32.mrf.mxu0 }
 0x189   : > { %v868_v51 = vadd.f32 %v867_v41, %v699_v35  ;;  %v621_v53 = vadd.f32 %v1434_v3, %v620_v49  ;;  %v879_v29 = vpop.f32.mrf.mxu3 }
 0x18a   : > { %v797_v54 = vpop.f32.mrf.mxu1 }
 0x18b   : > { %940 = vst [vmem:[%s1442_s6 + $0x1d0] sm:$0xff] %v868_v51  ;;  %v790_v55 = vadd.f32 %v789_v30, %v621_v53 }
 0x18d   : > { %909 = vst [vmem:[%s1442_s6 + $0xd8] sm:$0xff] %v790_v55 }
 0x18e   : > { %v700_v48 = vpop.f32.mrf.mxu2 }
 0x18f   : > { %v701_v56 = vadd.f32 %v1434_v3, %v700_v48 }
 0x190   : > { %v623_v57 = vpop.f32.mrf.mxu0 }
 0x191   : > { %v870_v58 = vadd.f32 %v869_v50, %v701_v56  ;;  %v624_v60 = vadd.f32 %v1434_v3, %v623_v57 }
 0x192   : > { %v799_v52 = vpop.f32.mrf.mxu1 }
 0x193   : > { %941 = vst [vmem:[%s1442_s6 + $0x1d8] sm:$0xff] %v870_v58  ;;  %v793_v62 = vadd.f32 %v792_v38, %v624_v60 }
 0x195   : > { %910 = vst [vmem:[%s1442_s6 + $0xe0] sm:$0xff] %v793_v62 }
 0x196   : > { %v703_v0 = vpop.f32.mrf.mxu2 }
 0x197   : > { %v704_v1 = vadd.f32 %v1434_v3, %v703_v0 }
 0x198   : > { %v625_v2 = vpop.f32.mrf.mxu0 }
 0x199   : > { %v873_v5 = vadd.f32 %v872_v61, %v704_v1  ;;  %v626_v59 = vadd.f32 %v1434_v3, %v625_v2 }
 0x19a   : > { %v802_v6 = vpop.f32.mrf.mxu1 }
 0x19b   : > { %942 = vst [vmem:[%s1442_s6 + $0x1e0] sm:$0xff] %v873_v5  ;;  %v795_v7 = vadd.f32 %v794_v45, %v626_v59  ;;  %v803_v8 = vadd.f32 %v802_v6, %v634_v4 }
 0x19d   : > { %911 = vst [vmem:[%s1442_s6 + $0xe8] sm:$0xff] %v795_v7 }
 0x19e   : > { %914 = vst [vmem:[%s1442_s6 + $0x100] sm:$0xff] %v803_v8  ;;  %v705_v10 = vpop.f32.mrf.mxu2 }
 0x19f   : > { %v706_v13 = vadd.f32 %v1434_v3, %v705_v10 }
 0x1a0   : > { %v628_v14 = vpop.f32.mrf.mxu0 }
 0x1a1   : > { %v875_v63 = vadd.f32 %v874_v9, %v706_v13  ;;  %v629_v16 = vadd.f32 %v1434_v3, %v628_v14 }
 0x1a2   : > { %v804_v17 = vpop.f32.mrf.mxu1 }
 0x1a3   : > { %943 = vst [vmem:[%s1442_s6 + $0x1e8] sm:$0xff] %v875_v63  ;;  %v798_v18 = vadd.f32 %v797_v54, %v629_v16  ;;  %v805_v15 = vadd.f32 %v804_v17, %v636_v12 }
 0x1a5   : > { %912 = vst [vmem:[%s1442_s6 + $0xf0] sm:$0xff] %v798_v18 }
 0x1a6   : > { %915 = vst [vmem:[%s1442_s6 + $0x108] sm:$0xff] %v805_v15  ;;  %v708_v20 = vpop.f32.mrf.mxu2 }
 0x1a7   : > { %v709_v21 = vadd.f32 %v1434_v3, %v708_v20 }
 0x1a8   : > { %v630_v22 = vpop.f32.mrf.mxu0 }
 0x1a9   : > { %v878_v28 = vadd.f32 %v877_v11, %v709_v21  ;;  %v631_v23 = vadd.f32 %v1434_v3, %v630_v22 }
 0x1ab   : > { %944 = vst [vmem:[%s1442_s6 + $0x1f0] sm:$0xff] %v878_v28  ;;  %v800_v24 = vadd.f32 %v799_v52, %v631_v23 }
 0x1ad   : > { %913 = vst [vmem:[%s1442_s6 + $0xf8] sm:$0xff] %v800_v24 }
 0x1ae   : > { %v710_v25 = vpop.f32.mrf.mxu2 }
 0x1af   : > { %v711_v27 = vadd.f32 %v1434_v3, %v710_v25 }
 0x1b1   : > { %v880_v30 = vadd.f32 %v879_v29, %v711_v27 }
 0x1b3   : > { %945 = vst [vmem:[%s1442_s6 + $0x1f8] sm:$0xff] %v880_v30 }
 0x1b4   : > { %1190 = shalt.err (!%p1187_p3)
}
 0x1b5   : > { %s1228_s29 = smov 128   ;;  %s1229_s30 = smov 8  }
 0x1b6   : > { %1120 = dma.vmem_to_hbm [thread:$0]  (%p1288_p5), %s960_s11, 8192, %s962_s17, %s947_s16, %s1228_s29, %s1228_s29, %s1229_s30  }
 0x1b7 PF: > { %p1126_p4 = scmp.ge.s32.totalorder %s1225_s15, 2  ;;  %s976_s4 = sand.u32 1, %s1213_s12  }
 0x1b8   : > { %s977_s5 = scalar_lea.sflag [#allocation3], %s976_s4 }
 0x1b9   : > { %p1123_p7 = pnand %p1126_p4, %p1292_p6 }
 0x1bb   : > { %p1124_p8 = pneg %p1123_p7 }
 0x1bd   : > { %1208 = dma.done.wait (%p1124_p8), %s977_s5, 8192  }
 0x1be   : > { %1210 = vsyncadd (%p1124_p8), %s977_s5, 4294959104  ;;  %p13_p9 = scmp.ge.s32.totalorder %s1275_s18, 4   ;;  %s1714_s12 = smov %s1217_s13 }
 0x1bf   : > { %s1715_s13 = smov %s1221_s14  ;;  %s1716_s14 = smov %s1286_s21 }
 0x1c0   : > { %s1717_s15 = smov %s1275_s18  ;;  %15 = sbr.rel (!%p13_p9) target bundleno = 3 (0x3), region = 67 }
 0x1c5   :  { %983 = vsyncpa [#allocation3], 1 }
 0x1c6   :  { %985 = vsyncpa [#allocation3 + $0x1], 1 }

</bundles_post_ra>
